<compile_context>
chip_gen: v7x
topology: tpu7x:2x2x1
jax: 0.10.0
libtpu: 0.0.40
codegen_flags: <defaults>
</compile_context>

<pallas_src>
import jax
import jax.numpy as jnp
from jax.experimental import pallas as pl
from jax.experimental.pallas import tpu as pltpu

H, W = 16, 16          # spatial
HW = H * W             # 256 -> lane-dense (2 x 128)
C_IN = 4               # input channels
F = 32                 # backbone feature channels
MASK_C = 1             # seg head output channels
NUM_CLS = 1            # classify head output dim
KH = KW = 3            # backbone conv kernel
K = KH * KW * C_IN     # im2col contraction size = 36
K1 = K + 1             # +1 ones row: conv bias folded into the matmul


def segcls_kernel(p_ref, wc_ref, wh_ref, out_ref):
    # p_ref  : (K1, NB*HW)  bf16 im2col patches (+ones row), pixels on lanes
    # wc_ref : (F, K1)      bf16 backbone conv weights (bias column folded in)
    # wh_ref : (2, F)       bf16 fused [seg; cls] head weights
    # out_ref: (2, NB*HW)   f32: row 0 = mask logits, row 1 = per-pixel cls proj

    # backbone: single bf16 MXU matmul (bias via ones row) + f32 ReLU on VPU
    feat = jnp.dot(wc_ref[...], p_ref[...],
                   preferred_element_type=jnp.float32)        # (F, NB*HW) f32
    feat = jnp.maximum(feat, 0.0)

    # fused seg + classify heads: one (2,F)x(F,NB*HW) matmul, lane-dense store
    out_ref[...] = jnp.dot(wh_ref[...], feat.astype(jnp.bfloat16),
                           preferred_element_type=jnp.float32)


@jax.jit
def model_forward(x_nchw, params):
    N = x_nchw.shape[0]
    NB = N if N <= 8 else 8          # images per grid step
    assert N % NB == 0, "pad the batch to a multiple of NB"
    NHW = N * HW

    # --- im2col preamble: pad + 9 shifted slices -> lane-dense (K1, N*HW) ---
    xp = jnp.pad(x_nchw, ((0, 0), (0, 0), (1, 1), (1, 1)))          # pad=1
    cols = [xp[:, :, dy:dy + H, dx:dx + W]
            for dy in range(KH) for dx in range(KW)]                # 9x(N,C,H,W)
    patches = jnp.stack(cols, axis=1).reshape(N, K, HW)             # (N,K,HW)
    patches = jnp.transpose(patches, (1, 0, 2)).reshape(K, NHW)     # (K,N*HW)
    ones = jnp.ones((1, NHW), jnp.float32)                          # bias row
    patches = jnp.concatenate([patches, ones], axis=0).astype(jnp.bfloat16)

    # weight prep: backbone (F, K1) with bias column; heads fused into (2, F)
    wc = jnp.concatenate(
        [params['w_conv'].reshape(K, F).T, params['b_conv'].reshape(F, 1)],
        axis=1).astype(jnp.bfloat16)                                # (F, K1)
    wh = jnp.concatenate([params['w_seg'].T, params['w_cls'].T],
                         axis=0).astype(jnp.bfloat16)               # (2, F)

    flops = 2 * F * K1 * NHW + 2 * 2 * F * NHW
    bytes_accessed = 2 * (K1 * NHW + F * K1 + 2 * F) + 4 * 2 * NHW

    out = pl.pallas_call(
        segcls_kernel,
        out_shape=jax.ShapeDtypeStruct((2, NHW), jnp.float32),
        grid_spec=pltpu.PrefetchScalarGridSpec(
            num_scalar_prefetch=0,
            grid=(N // NB,),
            in_specs=[
                pl.BlockSpec((K1, NB * HW), lambda i: (0, i)),
                pl.BlockSpec((F, K1), lambda i: (0, 0)),
                pl.BlockSpec((2, F), lambda i: (0, 0)),
            ],
            out_specs=pl.BlockSpec((2, NB * HW), lambda i: (0, i)),
        ),
        compiler_params=pltpu.CompilerParams(
            dimension_semantics=("arbitrary",),
            allow_input_fusion=[True, False, False]),
        cost_estimate=pl.CostEstimate(flops=flops, transcendentals=0,
                                      bytes_accessed=bytes_accessed),
    )(patches, wc, wh)

    # head biases + class pooling in the (tiny) epilogue.
    # row 0 is already NCHW order for a 1-channel mask -> just reshape.
    mask = out[0].reshape(N, MASK_C, H, W) + params['b_seg'].reshape(1, MASK_C, 1, 1)
    # class logit: mean over pixels of (w_cls . feat) + b_cls  (linearity of pool)
    contrast_exist = out[1].reshape(N, HW).mean(axis=1, keepdims=True) + params['b_cls']
    return {'mask': mask, 'contrast_exist': contrast_exist}


def reference_forward(x_nchw, params):
    """Pure-JAX f32 reference for correctness checking."""
    x = jnp.transpose(x_nchw, (0, 2, 3, 1))
    feat = jax.lax.conv_general_dilated(
        x, params['w_conv'], window_strides=(1, 1), padding='SAME',
        dimension_numbers=('NHWC', 'HWIO', 'NHWC'))
    feat = jnp.maximum(feat + params['b_conv'], 0.0)
    mask = jnp.einsum('nhwf,fo->nhwo', feat, params['w_seg']) + params['b_seg']
    pooled = jnp.mean(feat, axis=(1, 2))
    cls = pooled @ params['w_cls'] + params['b_cls']
    return {'mask': jnp.transpose(mask, (0, 3, 1, 2)), 'contrast_exist': cls}


if __name__ == "__main__":
    key = jax.random.PRNGKey(0)
    ks = jax.random.split(key, 8)
    x = jax.random.normal(ks[0], (2, C_IN, H, W), jnp.float32)
    params = {
        # NOTE: HWIO layout here; real PyTorch checkpoints are OIHW and would
        # need an explicit transpose before the reshape(K, F).
        'w_conv': jax.random.normal(ks[1], (KH, KW, C_IN, F), jnp.float32) * 0.1,
        'b_conv': jax.random.normal(ks[2], (F,), jnp.float32) * 0.1,
        'w_seg':  jax.random.normal(ks[3], (F, MASK_C), jnp.float32) * 0.1,
        'b_seg':  jax.random.normal(ks[4], (MASK_C,), jnp.float32) * 0.1,
        'w_cls':  jax.random.normal(ks[5], (F, NUM_CLS), jnp.float32) * 0.1,
        'b_cls':  jax.random.normal(ks[6], (NUM_CLS,), jnp.float32) * 0.1,
    }

    out = model_forward(x, params)
    jax.block_until_ready(out)

    ref = reference_forward(x, params)
    assert out['mask'].shape == (2, MASK_C, H, W)
    assert out['contrast_exist'].shape == (2, NUM_CLS)
    # bf16 MXU operands (f32 accumulation) -> loosened tolerances
    assert jnp.allclose(out['mask'], ref['mask'], atol=2e-2, rtol=2e-2)
    assert jnp.allclose(out['contrast_exist'], ref['contrast_exist'],
                        atol=2e-2, rtol=2e-2)
    print("KERNEL_OK")
</pallas_src>

<mosaic_0001>
module attributes {stable_mosaic.version = 11 : i64} {
  func.func @segcls_kernel(%arg0: i32, %arg1: memref<37x512xbf16, #tpu.memory_space<vmem>>, %arg2: memref<32x37xbf16, #tpu.memory_space<vmem>>, %arg3: memref<2x32xbf16, #tpu.memory_space<vmem>>, %arg4: memref<2x512xf32, #tpu.memory_space<vmem>>) attributes {dimension_semantics = [#tpu.dimension_semantics<arbitrary>], iteration_bounds = array<i64: 1>, scalar_prefetch = 0 : i64, scratch_operands = 0 : i64, tpu.core_type = #tpu.core_type<tc>, window_params = [{transform_indices = @transform_0, window_bounds = array<i64: 37, 512>}, {pipeline_mode = #tpu.pipeline_mode<synchronous>, transform_indices = @transform_1, window_bounds = array<i64: 32, 37>}, {pipeline_mode = #tpu.pipeline_mode<synchronous>, transform_indices = @transform_2, window_bounds = array<i64: 2, 32>}, {transform_indices = @transform_3, window_bounds = array<i64: 2, 512>}]} {
    %c0 = arith.constant 0 : index
    %c0_0 = arith.constant 0 : index
    %0 = vector.load %arg2[%c0, %c0_0] : memref<32x37xbf16, #tpu.memory_space<vmem>>, vector<32x37xbf16>
    %c0_1 = arith.constant 0 : index
    %c0_2 = arith.constant 0 : index
    %1 = vector.load %arg1[%c0_1, %c0_2] : memref<37x512xbf16, #tpu.memory_space<vmem>>, vector<37x512xbf16>
    %cst = arith.constant dense<0.000000e+00> : vector<32x512xf32>
    %2 = tpu.matmul %0, %1, %cst {dimension_numbers = #tpu.dot_dimension_numbers<[1], [0], [0], [1], [0, 0, 1, 1], [], []>} : vector<32x37xbf16>, vector<37x512xbf16>, vector<32x512xf32> -> vector<32x512xf32>
    %cst_3 = arith.constant 0.000000e+00 : f32
    %3 = vector.broadcast %cst_3 : f32 to vector<32x512xf32>
    %4 = arith.maximumf %2, %3 : vector<32x512xf32>
    %c0_4 = arith.constant 0 : index
    %c0_5 = arith.constant 0 : index
    %5 = vector.load %arg3[%c0_4, %c0_5] : memref<2x32xbf16, #tpu.memory_space<vmem>>, vector<2x32xbf16>
    %6 = arith.truncf %4 : vector<32x512xf32> to vector<32x512xbf16>
    %cst_6 = arith.constant dense<0.000000e+00> : vector<2x512xf32>
    %7 = tpu.matmul %5, %6, %cst_6 {dimension_numbers = #tpu.dot_dimension_numbers<[1], [0], [0], [1], [0, 0, 1, 1], [], []>} : vector<2x32xbf16>, vector<32x512xbf16>, vector<2x512xf32> -> vector<2x512xf32>
    %c0_7 = arith.constant 0 : index
    %c0_8 = arith.constant 0 : index
    %8 = vector.load %arg4[%c0_7, %c0_8] : memref<2x512xf32, #tpu.memory_space<vmem>>, vector<2x512xf32>
    tpu.vector_store %arg4[%c0_7, %c0_8], %7 {strides = array<i32>} : memref<2x512xf32, #tpu.memory_space<vmem>>, vector<2x512xf32>,
    return
  }
  func.func @transform_0(%arg0: i32) -> (i32, i32) {
    %c0_i32 = arith.constant 0 : i32
    %c0_i32_0 = arith.constant 0 : i32
    return %c0_i32, %arg0 : i32, i32
  }
  func.func @transform_1(%arg0: i32) -> (i32, i32) {
    %c0_i32 = arith.constant 0 : i32
    %c0_i32_0 = arith.constant 0 : i32
    %c0_i32_1 = arith.constant 0 : i32
    return %c0_i32, %c0_i32_0 : i32, i32
  }
  func.func @transform_2(%arg0: i32) -> (i32, i32) {
    %c0_i32 = arith.constant 0 : i32
    %c0_i32_0 = arith.constant 0 : i32
    %c0_i32_1 = arith.constant 0 : i32
    return %c0_i32, %c0_i32_0 : i32, i32
  }
  func.func @transform_3(%arg0: i32) -> (i32, i32) {
    %c0_i32 = arith.constant 0 : i32
    %c0_i32_0 = arith.constant 0 : i32
    return %c0_i32, %arg0 : i32, i32
  }
}

</mosaic_0001>

<bundles_post_ra>
// kernel: squeeze.3
= control target key start
LH: loop header
LB: loop body
LE: loop exit
PB: predicated region body
PF: predicated region fallthrough
CT: control target
= control target key end

     0   :  { %s41_s0 = inlined_call_operand.vmem [shape: f32[512], index: 0, kind: input, shape index: {}]   ;;  %s42_s1 = inlined_call_operand.vmem [shape: f32[2,256], index: 1, kind: output, shape index: {}]  }
   0x1   :  { %v4_v0 = vld [vmem:[%s41_s0] sm:$0xf] }
   0x2   :  { %5 = vst [vmem:[#allocation1] sm:$0xf] %v4_v0 }
   0x9   :  { %v6_v1 = vld [vmem:[#allocation1] sm:$0xf]  }
   0xa   :  { %7 = vst [vmem:[#allocation0] ss:$8 sm:$0x3] %v6_v1   ;;  %9 = vst [vmem:[#allocation0 - $0xf] ss:$8 sm:$0xc] %v6_v1  }
  0x11   :  { %v13_v2 = vld [vmem:[#allocation0] sm:$0x3]  ;;  %v17_v3 = vld [vmem:[#allocation0 + $0x8] sm:$0x3] }
  0x12   :  { %15 = vst [vmem:[%s42_s1] sm:$0x3] %v13_v2  ;;  %21 = vst [vmem:[%s42_s1 + $0x2] sm:$0x3] %v17_v3 }

// kernel: model_forward.2
= control target key start
LH: loop header
LB: loop body
LE: loop exit
PB: predicated region body
PF: predicated region fallthrough
CT: control target
= control target key end

     0   :  { %s842_s0 = inlined_call_operand.vmem [shape: bf16[32,37], index: 0, kind: input, shape index: {}]   ;;  %s843_s1 = inlined_call_operand.vmem [shape: bf16[2,32], index: 1, kind: input, shape index: {}]   ;;  %s844_s2 = inlined_call_operand.vmem [shape: bf16[36,512], index: 2, kind: input, shape index: {}]   ;;  %s845_s3 = inlined_call_operand.<no memory space> [shape: bf16[], index: 3, kind: input, shape index: {}]   ;;  %s846_s4 = inlined_call_operand.vmem [shape: f32[2,512], index: 4, kind: output, shape index: {}]  }
   0x1   :  { %v9_v0 = vstv %s845_s3 }
   0x2   :  { %v10_v1 = vunpack.i.l.bf16 %v9_v0 }
   0x3   :  { %v20_v2 = vld [vmem:[%s844_s2] sm:$0xff]   ;;  %v239_v3 = vlaneseq  ;;  %v741_v4 = vld [vmem:[%s844_s2 + $0x10] sm:$0xff]   ;;  %v742_v5 = vld [vmem:[%s844_s2 + $0x8] sm:$0xff]   ;;  %v760_v22 = vmov 0   ;;  %v761_v31 = vmov 0.0   ;;  %vm396_vm1 = vcmask 1041408  }
   0x4   :  { %30 = vst [vmem:[#allocation7] sm:$0xff] %v20_v2   ;;  %v743_v7 = vld [vmem:[%s844_s2 + $0x18] sm:$0xff]   ;;  %v746_v8 = vld [vmem:[%s844_s2 + $0x20] sm:$0xff]   ;;  %v747_v12 = vld [vmem:[%s844_s2 + $0x30] sm:$0xff]   ;;  %444 = vmatprep.mubr.bf16.mxu0 %v760_v22  ;;  %497 = vmatprep.mubr.bf16.mxu1 %v760_v22  ;;  %vm397_vm2 = vcmask 1042432   ;;  %v762_v38 = vmov 65535  }
   0x5   :  { %v801_v6 = vshrl.u32 %v239_v3, 7  ;;  %v680_v10 = vcombine.high %v742_v5, %v743_v7  ;;  %v679_v11 = vcombine.low %v742_v5, %v743_v7  ;;  %v749_v13 = vld [vmem:[%s844_s2 + $0x28] sm:$0xff]   ;;  %v750_v14 = vld [vmem:[%s844_s2 + $0x38] sm:$0xff]   ;;  %v671_v15 = vld [vmem:[%s844_s2 + $0x40] sm:$0xff]   ;;  %v682_v18 = vcombine.high %v746_v8, %v747_v12 }
   0x6   :  { %v673_v16 = vld [vmem:[%s844_s2 + $0x48] sm:$0xff]   ;;  %v237_v19 = vunpack.c.l.bf16 %v671_v15  ;;  %v259_v20 = vunpack.c.h.bf16 %v671_v15  ;;  %v684_v25 = vcombine.high %v749_v13, %v750_v14  ;;  %v683_v26 = vcombine.low %v749_v13, %v750_v14  ;;  %v758_v51 = vld [vmem:[%s842_s0] sm:$0xff]  }
   0x7   :  { %v241_v9 = vadd.s32 32, %v801_v6  ;;  %465 = vmatprep.subr.bf16.mxu1 %v680_v10  ;;  %v281_v21 = vunpack.c.l.bf16 %v673_v16  ;;  %v303_v30 = vunpack.c.h.bf16 %v673_v16  ;;  %v681_v35 = vcombine.low %v746_v8, %v747_v12  ;;  %v759_v52 = vld [vmem:[%s842_s0 + $0x8] sm:$0xff]  }
   0x8   :  { %466 = vmatpush1.bf16.msra.mxu1 %v679_v11  ;;  %v398_v39 = vsel %vm396_vm1, 4294967295, %v762_v38  ;;  %vm389_vm3 = vcmask 302080   ;;  %vm543_vm4 = vcmask 261120  }
   0x9   :  { %vm242_vm0 = vcmp.lt.s32.totalorder %v241_v9, 36  ;;  %467 = vmatprep.subr.bf16.mxu1 %v684_v25  ;;  %v399_v41 = vsel %vm397_vm2, %v398_v39, 0 }
   0xa   :  { %v243_v27 = vsel %vm242_vm0, %v237_v19, %v10_v1  ;;  %v265_v28 = vsel %vm242_vm0, %v259_v20, %v10_v1  ;;  %v287_v29 = vsel %vm242_vm0, %v281_v21, %v10_v1  ;;  %v309_v36 = vsel %vm242_vm0, %v303_v30, %v10_v1  ;;  %v534_v30 = vld [vmem:[%s843_s1] sm:$0x1] }
   0xb   :  { %v319_v17 = vld [vmem:[#allocation7] sm:$0xff]  ;;  %v245_v32 = vpack.c.bf16 %v761_v31, %v243_v27  ;;  %v267_v33 = vpack.c.bf16 %v761_v31, %v265_v28  ;;  %v289_v34 = vpack.c.bf16 %v761_v31, %v287_v29  ;;  %v311_v37 = vpack.c.bf16 %v761_v31, %v309_v36 }
   0xc   :  { %v678_v23 = vcombine.high %v319_v17, %v741_v4  ;;  %v677_v24 = vcombine.low %v319_v17, %v741_v4  ;;  %468 = vmatpush1.bf16.msra.mxu1 %v683_v26  ;;  %v763_v31 = vmov 1983009808  }
   0xd   :  { %247 = vst [vmem:[#allocation7 + $0x40] sm:$0xf] %v245_v32  ;;  %269 = vst [vmem:[#allocation7 + $0x44] sm:$0xf] %v267_v33  ;;  %v636_v32 = vunpack.c.l.s4 %v763_v31 }
   0xe   :  { %412 = vmatprep.subr.bf16.mxu0 %v678_v23  ;;  %291 = vst [vmem:[#allocation7 + $0x48] sm:$0xf] %v289_v34  ;;  %313 = vst [vmem:[#allocation7 + $0x4c] sm:$0xf] %v311_v37 }
   0xf   :  { %413 = vmatpush1.bf16.msra.mxu0 %v677_v24  ;;  %v637_v33 = vunpack.c.0.s8 %v636_v32 }
  0x10   :  { %414 = vmatprep.subr.bf16.mxu0 %v682_v18 }
  0x13   :  { %415 = vmatpush1.bf16.msra.mxu0 %v681_v35  ;;  %v640_v35 = vsub.s32 %v637_v33, %v801_v6 }
  0x14   :  { %v327_v40 = vld [vmem:[#allocation7 + $0x40] sm:$0x77] }
  0x15   :  { %v686_v42 = vcombine.high %v327_v40, %v327_v40  ;;  %v685_v43 = vcombine.low %v327_v40, %v327_v40  ;;  %v328_v44 = vld [vmem:[#allocation7 + $0x48] sm:$0x77] }
  0x16   :  { %v688_v46 = vcombine.high %v328_v44, %v328_v44  ;;  %v687_v48 = vcombine.low %v328_v44, %v328_v44 }
  0x17   :  { %v404_v45 = vand.u32 %v686_v42, %v399_v41  ;;  %v401_v47 = vand.u32 %v685_v43, %v399_v41 }
  0x18   :  { %v410_v49 = vand.u32 %v688_v46, %v399_v41  ;;  %v407_v50 = vand.u32 %v687_v48, %v399_v41 }
  0x19   :  { %416 = vmatprep.subr.bf16.mxu0 %v404_v45 }
  0x1a   :  { %417 = vmatpush1.bf16.msra.mxu0 %v401_v47  ;;  %469 = vmatprep.subr.bf16.mxu1 %v410_v49 }
  0x1b   :  { %470 = vmatpush1.bf16.msra.mxu1 %v407_v50 }
  0x1d   :  { %689 = vmatmul.mubr.msk.bf16.vlgmr.msra.gmra.mrb[0].mxu0 %vm389_vm3, %v758_v51 }
  0x1e   :  { %454 = vmatprep.mubr.bf16.mxu0 %v760_v22  ;;  %691 = vmatmul.mubr.msk.bf16.vlgmr.msra.gmra.mrb[0].mxu1 %vm389_vm3, %v758_v51 }
  0x1f   :  { %507 = vmatprep.mubr.bf16.mxu1 %v760_v22 }
  0x25   :  { %690 = vmatmul.mubr.msk.bf16.gmra.mrb[4].mxu0 %vm389_vm3, %v759_v52 }
  0x26   :  { %579 = vmatprep.mubr.bf16.mxu0 %v760_v22  ;;  %692 = vmatmul.mubr.msk.bf16.gmra.mrb[4].mxu1 %vm389_vm3, %v759_v52 }
  0x27   :  { %620 = vmatprep.mubr.bf16.mxu1 %v760_v22 }
  0xf0   :  { %v446_v53 = vpop.f32.mrb[0].mxu0 }
  0xf1   :  { %v448_v54 = vpop.f32.mrb[1].mxu0  ;;  %v499_v55 = vpop.f32.mrb[0].mxu1  ;;  %v518_v57 = vmax.f32 %v446_v53, 0.0 }
  0xf2   :  { %v450_v56 = vpop.f32.mrb[2].mxu0  ;;  %v501_v58 = vpop.f32.mrb[1].mxu1  ;;  %v519_v61 = vmax.f32 %v448_v54, 0.0  ;;  %v520_v0 = vmax.f32 %v499_v55, 0.0 }
  0xf3   :  { %v522_v59 = vmax.f32 %v450_v56, 0.0  ;;  %v452_v60 = vpop.f32.mrb[3].mxu0  ;;  %v503_v62 = vpop.f32.mrb[2].mxu1  ;;  %v521_v4 = vmax.f32 %v501_v58, 0.0 }
  0xf4   :  { %v523_v63 = vmax.f32 %v452_v60, 0.0  ;;  %v524_v2 = vmax.f32 %v503_v62, 0.0  ;;  %v505_v3 = vpop.f32.mrb[3].mxu1 }
  0xf5   :  { %v535_v1 = vpack.c.bf16 %v522_v59, %v518_v57  ;;  %v525_v7 = vmax.f32 %v505_v3, 0.0 }
  0xf6   :  { %v536_v5 = vpack.c.bf16 %v523_v63, %v519_v61  ;;  %v537_v8 = vpack.c.bf16 %v524_v2, %v520_v0 }
  0xf7   :  { %v538_v9 = vpack.c.bf16 %v525_v7, %v521_v4 }
  0xf8   :  { %v456_v10 = vpop.f32.mrb[4].mxu0  ;;  %547 = vmatprep.subr.bf16.mxu0 %v536_v5 }
  0xf9   :  { %v458_v11 = vpop.f32.mrb[5].mxu0  ;;  %548 = vmatpush1.bf16.msra.mxu0 %v535_v1  ;;  %v509_v12 = vpop.f32.mrb[4].mxu1  ;;  %588 = vmatprep.subr.bf16.mxu1 %v538_v9  ;;  %v526_v14 = vmax.f32 %v456_v10, 0.0 }
  0xfa   :  { %v460_v13 = vpop.f32.mrb[6].mxu0  ;;  %v511_v15 = vpop.f32.mrb[5].mxu1  ;;  %589 = vmatpush1.bf16.msra.mxu1 %v537_v8  ;;  %v527_v18 = vmax.f32 %v458_v11, 0.0  ;;  %v528_v21 = vmax.f32 %v509_v12, 0.0 }
  0xfb   :  { %v530_v16 = vmax.f32 %v460_v13, 0.0  ;;  %v462_v17 = vpop.f32.mrb[7].mxu0  ;;  %v513_v19 = vpop.f32.mrb[6].mxu1  ;;  %v529_v25 = vmax.f32 %v511_v15, 0.0 }
  0xfc   :  { %v531_v20 = vmax.f32 %v462_v17, 0.0  ;;  %v532_v23 = vmax.f32 %v513_v19, 0.0  ;;  %v515_v24 = vpop.f32.mrb[7].mxu1 }
  0xfd   :  { %v539_v22 = vpack.c.bf16 %v530_v16, %v526_v14  ;;  %v533_v27 = vmax.f32 %v515_v24, 0.0 }
  0xfe   :  { %v540_v26 = vpack.c.bf16 %v531_v20, %v527_v18  ;;  %v541_v28 = vpack.c.bf16 %v532_v23, %v528_v21 }
  0xff   :  { %v542_v29 = vpack.c.bf16 %v533_v27, %v529_v25 }
 0x100   :  { %549 = vmatprep.subr.bf16.mxu0 %v540_v26 }
 0x101   :  { %550 = vmatpush1.bf16.msra.mxu0 %v539_v22  ;;  %590 = vmatprep.subr.bf16.mxu1 %v542_v29 }
 0x102   :  { %591 = vmatpush1.bf16.msra.mxu1 %v541_v28 }
 0x104   :  { %693 = vmatmul.mubr.msk.bf16.vlgmr.msra.gmra.mrb[8].mxu0 %vm543_vm4, %v534_v30 }
 0x105   :  { %694 = vmatmul.mubr.msk.bf16.vlgmr.msra.gmra.mrb[8].mxu1 %vm543_vm4, %v534_v30 }
 0x1d7   :  { %v581_v34 = vpop.f32.mrb[8].mxu0 }
 0x1d8   :  { %v583_v36 = vpop.f32.mrb[9].mxu0  ;;  %v622_v37 = vpop.f32.mrb[8].mxu1 }
 0x1d9   :  { %v633_v38 = vcombine.low %v581_v34, %v583_v36  ;;  %v585_v39 = vpop.f32.mrb[10].mxu0  ;;  %v624_v40 = vpop.f32.mrb[9].mxu1 }
 0x1da   :  { %v586_v41 = vpop.f32.mrb[11].mxu0  ;;  %v634_v43 = vcombine.low %v622_v37, %v624_v40  ;;  %v626_v44 = vpop.f32.mrb[10].mxu1 }
 0x1db   :  { %v641_v42 = vrot.slane %v633_v38, %v640_v35  ;;  %v627_v45 = vpop.f32.mrb[11].mxu1 }
 0x1dc   :  { %v648_v46 = vrot.slane %v634_v43, %v640_v35 }
 0x1de   :  { %v649_v47 = vcombine.low %v641_v42, %v648_v46 }
 0x1e0   :  { %651 = vst [vmem:[%s846_s4] sm:$0xff] %v649_v47 }

</bundles_post_ra>
